<compile_context>
chip_gen: v7x
topology: tpu7x:2x2x1
jax: 0.10.0
libtpu: 0.0.40
codegen_flags: <defaults>
</compile_context>

<pallas_src>
import functools
import jax
import jax.numpy as jnp
from jax.experimental import pallas as pl
from jax.experimental.pallas import tpu as pltpu

LANE = 128


def _round_up(x, m):
    return ((x + m - 1) // m) * m


def _mlp_kernel(x_ref, w1_ref, b1_ref, w2_ref, b2_ref, w3_ref, b3_ref, o_ref,
                *, last_layer_activation):
    x = x_ref[...]                       # [block_b, in]  (compute dtype)
    w1 = w1_ref[...]
    w2 = w2_ref[...]
    w3 = w3_ref[...]

    # fc1 + relu  (MXU matmul, f32 accumulate; elementwise stays f32)
    h = jnp.dot(x, w1, preferred_element_type=jnp.float32) + b1_ref[...]
    h = jnp.maximum(h, 0.0)
    # fc2 + relu  (re-cast activations to the MXU input dtype)
    h = jnp.dot(h.astype(w2.dtype), w2,
                preferred_element_type=jnp.float32) + b2_ref[...]
    h = jnp.maximum(h, 0.0)
    # fc3 (+ optional tanh); output columns are zero-padded to a lane multiple
    y = jnp.dot(h.astype(w3.dtype), w3,
                preferred_element_type=jnp.float32) + b3_ref[...]
    if last_layer_activation == 'tanh':
        y = jnp.tanh(y)
    o_ref[...] = y.astype(o_ref.dtype)


def mlp_forward(x, params, *, last_layer_activation='none', block_b=None,
                compute_dtype=jnp.float32, vmem_limit_bytes=None):
    """x: [B, input_size] f32. params: dict of w1,b1,w2,b2,w3,b3 with
    w_i stored as [in, out], b_i as [1, out].

    compute_dtype: dtype used for x / weights on the MXU (jnp.bfloat16
    recommended on v5e/v6e/v7x); accumulation and elementwise math stay f32.
    """
    B, in_size = x.shape
    hid = params['w1'].shape[1]
    out_size = params['w3'].shape[1]
    out_pad = _round_up(out_size, LANE)      # lane-dense output store

    # batch tile: multiple of 8 (f32) / 16 (bf16); cap so VMEM stays small
    mult = 16 if compute_dtype == jnp.bfloat16 else 8
    if block_b is None:
        block_b = min(512, _round_up(B, mult))
    block_b = max(mult, _round_up(block_b, mult))

    # pad batch so every grid block is full (padded rows are discarded below)
    B_pad = _round_up(B, block_b)
    if B_pad != B:
        x = jnp.pad(x, ((0, B_pad - B), (0, 0)))

    # cast streaming operands to the compute dtype; biases stay f32.
    xc = x.astype(compute_dtype)
    w1 = params['w1'].astype(compute_dtype)
    w2 = params['w2'].astype(compute_dtype)
    w3 = jnp.pad(params['w3'],
                 ((0, 0), (0, out_pad - out_size))).astype(compute_dtype)
    b1 = params['b1'].astype(jnp.float32)
    b2 = params['b2'].astype(jnp.float32)
    b3 = jnp.pad(params['b3'],
                 ((0, 0), (0, out_pad - out_size))).astype(jnp.float32)

    grid = (B_pad // block_b,)

    kernel = functools.partial(_mlp_kernel,
                               last_layer_activation=last_layer_activation)

    def resident(arr):
        # whole parameter resident every grid step (constant index_map).
        # TODO(synk): for 1k-4k hidden sizes add pipeline_mode=pl.Buffered(1)
        # (or a one-time manual copy from pl.ANY) to avoid double-buffering
        # weights that never change; irrelevant at these sizes.
        return pl.BlockSpec(arr.shape, lambda i: (0,) * arr.ndim)

    itemsize = jnp.dtype(compute_dtype).itemsize
    flops = 2 * B_pad * (in_size * hid + hid * hid + hid * out_pad)
    transcendentals = B_pad * out_pad if last_layer_activation == 'tanh' else 0
    bytes_accessed = (B_pad * in_size * itemsize
                      + (in_size * hid + hid * hid + hid * out_pad) * itemsize
                      + (hid + hid + out_pad) * 4
                      + B_pad * out_pad * 4)

    y = pl.pallas_call(
        kernel,
        out_shape=jax.ShapeDtypeStruct((B_pad, out_pad), jnp.float32),
        grid_spec=pltpu.PrefetchScalarGridSpec(
            num_scalar_prefetch=0,
            grid=grid,
            in_specs=[
                pl.BlockSpec((block_b, in_size), lambda i: (i, 0)),
                resident(w1), resident(b1),
                resident(w2), resident(b2),
                resident(w3), resident(b3),
            ],
            out_specs=pl.BlockSpec((block_b, out_pad), lambda i: (i, 0)),
        ),
        compiler_params=pltpu.CompilerParams(
            dimension_semantics=("parallel",),
            vmem_limit_bytes=vmem_limit_bytes),
        cost_estimate=pl.CostEstimate(flops=flops,
                                      transcendentals=transcendentals,
                                      bytes_accessed=bytes_accessed),
    )(xc, w1, b1, w2, b2, w3, b3)

    # strip batch padding and the lane-padding of the last layer
    return y[:B, :out_size]


def init_mlp_params(key, input_size, hidden_size, output_size):
    """Deterministic init mirroring nn.Linear shapes (weights stored [in, out])."""
    ks = jax.random.split(key, 6)

    def lin(kw, kb, fan_in, fan_out):
        bound = 1.0 / jnp.sqrt(jnp.float32(fan_in))
        w = jax.random.uniform(kw, (fan_in, fan_out), jnp.float32, -bound, bound)
        b = jax.random.uniform(kb, (1, fan_out), jnp.float32, -bound, bound)
        return w, b

    w1, b1 = lin(ks[0], ks[1], input_size, hidden_size)
    w2, b2 = lin(ks[2], ks[3], hidden_size, hidden_size)
    w3, b3 = lin(ks[4], ks[5], hidden_size, output_size)
    return dict(w1=w1, b1=b1, w2=w2, b2=b2, w3=w3, b3=b3)


def mlp_ref(x, p, last_layer_activation='none'):
    h = jnp.maximum(x @ p['w1'] + p['b1'], 0.0)
    h = jnp.maximum(h @ p['w2'] + p['b2'], 0.0)
    y = h @ p['w3'] + p['b3']
    if last_layer_activation == 'tanh':
        y = jnp.tanh(y)
    return y


if __name__ == "__main__":
    key = jax.random.PRNGKey(0)
    k_param, k_x = jax.random.split(key)

    batch, input_size, hidden_size, output_size = 32, 16, 32, 8
    params = init_mlp_params(k_param, input_size, hidden_size, output_size)
    x = jax.random.normal(k_x, (batch, input_size), jnp.float32)

    # exact f32 path (2-step 'parallel' grid, lane-padded output), 'none' + 'tanh'
    y_f32 = jax.block_until_ready(
        mlp_forward(x, params, last_layer_activation='none',
                    compute_dtype=jnp.float32, block_b=16))
    assert jnp.allclose(y_f32, mlp_ref(x, params, 'none'), atol=1e-5, rtol=1e-5)

    y_f32_t = jax.block_until_ready(
        mlp_forward(x, params, last_layer_activation='tanh',
                    compute_dtype=jnp.float32, block_b=16))
    assert jnp.allclose(y_f32_t, mlp_ref(x, params, 'tanh'), atol=1e-5, rtol=1e-5)

    # bf16 streaming / f32-accumulate fast path (looser tolerance for bf16 inputs)
    y_bf16 = jax.block_until_ready(
        mlp_forward(x, params, last_layer_activation='none',
                    compute_dtype=jnp.bfloat16, block_b=16))
    assert jnp.allclose(y_bf16, mlp_ref(x, params, 'none'), atol=5e-2, rtol=5e-2)

    print("KERNEL_OK")
</pallas_src>

<mosaic_0001>
module attributes {stable_mosaic.version = 11 : i64} {
  func.func @_mlp_kernel(%arg0: i32, %arg1: memref<16x16xf32, #tpu.memory_space<vmem>>, %arg2: memref<16x32xf32, #tpu.memory_space<vmem>>, %arg3: memref<1x32xf32, #tpu.memory_space<vmem>>, %arg4: memref<32x32xf32, #tpu.memory_space<vmem>>, %arg5: memref<1x32xf32, #tpu.memory_space<vmem>>, %arg6: memref<32x128xf32, #tpu.memory_space<vmem>>, %arg7: memref<1x128xf32, #tpu.memory_space<vmem>>, %arg8: memref<16x128xf32, #tpu.memory_space<vmem>>) attributes {dimension_semantics = [#tpu.dimension_semantics<parallel>], iteration_bounds = array<i64: 2>, scalar_prefetch = 0 : i64, scratch_operands = 0 : i64, tpu.core_type = #tpu.core_type<tc>, window_params = [{transform_indices = @transform_0, window_bounds = array<i64: 16, 16>}, {pipeline_mode = #tpu.pipeline_mode<synchronous>, transform_indices = @transform_1, window_bounds = array<i64: 16, 32>}, {pipeline_mode = #tpu.pipeline_mode<synchronous>, transform_indices = @transform_2, window_bounds = array<i64: 1, 32>}, {pipeline_mode = #tpu.pipeline_mode<synchronous>, transform_indices = @transform_3, window_bounds = array<i64: 32, 32>}, {pipeline_mode = #tpu.pipeline_mode<synchronous>, transform_indices = @transform_4, window_bounds = array<i64: 1, 32>}, {pipeline_mode = #tpu.pipeline_mode<synchronous>, transform_indices = @transform_5, window_bounds = array<i64: 32, 128>}, {pipeline_mode = #tpu.pipeline_mode<synchronous>, transform_indices = @transform_6, window_bounds = array<i64: 1, 128>}, {transform_indices = @transform_7, window_bounds = array<i64: 16, 128>}]} {
    %c0 = arith.constant 0 : index
    %c0_0 = arith.constant 0 : index
    %0 = vector.load %arg1[%c0, %c0_0] : memref<16x16xf32, #tpu.memory_space<vmem>>, vector<16x16xf32>
    %c0_1 = arith.constant 0 : index
    %c0_2 = arith.constant 0 : index
    %1 = vector.load %arg2[%c0_1, %c0_2] : memref<16x32xf32, #tpu.memory_space<vmem>>, vector<16x32xf32>
    %c0_3 = arith.constant 0 : index
    %c0_4 = arith.constant 0 : index
    %2 = vector.load %arg4[%c0_3, %c0_4] : memref<32x32xf32, #tpu.memory_space<vmem>>, vector<32x32xf32>
    %c0_5 = arith.constant 0 : index
    %c0_6 = arith.constant 0 : index
    %3 = vector.load %arg6[%c0_5, %c0_6] : memref<32x128xf32, #tpu.memory_space<vmem>>, vector<32x128xf32>
    %cst = arith.constant dense<0.000000e+00> : vector<16x32xf32>
    %4 = tpu.matmul %0, %1, %cst {dimension_numbers = #tpu.dot_dimension_numbers<[1], [0], [0], [1], [0, 0, 1, 1], [], []>} : vector<16x16xf32>, vector<16x32xf32>, vector<16x32xf32> -> vector<16x32xf32>
    %c0_7 = arith.constant 0 : index
    %c0_8 = arith.constant 0 : index
    %5 = vector.load %arg3[%c0_7, %c0_8] : memref<1x32xf32, #tpu.memory_space<vmem>>, vector<1x32xf32>
    %6 = vector.broadcast %5 : vector<1x32xf32> to vector<16x32xf32>
    %7 = arith.addf %4, %6 : vector<16x32xf32>
    %cst_9 = arith.constant 0.000000e+00 : f32
    %8 = vector.broadcast %cst_9 : f32 to vector<16x32xf32>
    %9 = arith.maximumf %7, %8 : vector<16x32xf32>
    %cst_10 = arith.constant dense<0.000000e+00> : vector<16x32xf32>
    %10 = tpu.matmul %9, %2, %cst_10 {dimension_numbers = #tpu.dot_dimension_numbers<[1], [0], [0], [1], [0, 0, 1, 1], [], []>} : vector<16x32xf32>, vector<32x32xf32>, vector<16x32xf32> -> vector<16x32xf32>
    %c0_11 = arith.constant 0 : index
    %c0_12 = arith.constant 0 : index
    %11 = vector.load %arg5[%c0_11, %c0_12] : memref<1x32xf32, #tpu.memory_space<vmem>>, vector<1x32xf32>
    %12 = vector.broadcast %11 : vector<1x32xf32> to vector<16x32xf32>
    %13 = arith.addf %10, %12 : vector<16x32xf32>
    %cst_13 = arith.constant 0.000000e+00 : f32
    %14 = vector.broadcast %cst_13 : f32 to vector<16x32xf32>
    %15 = arith.maximumf %13, %14 : vector<16x32xf32>
    %cst_14 = arith.constant dense<0.000000e+00> : vector<16x128xf32>
    %16 = tpu.matmul %15, %3, %cst_14 {dimension_numbers = #tpu.dot_dimension_numbers<[1], [0], [0], [1], [0, 0, 1, 1], [], []>} : vector<16x32xf32>, vector<32x128xf32>, vector<16x128xf32> -> vector<16x128xf32>
    %c0_15 = arith.constant 0 : index
    %c0_16 = arith.constant 0 : index
    %17 = vector.load %arg7[%c0_15, %c0_16] : memref<1x128xf32, #tpu.memory_space<vmem>>, vector<1x128xf32>
    %18 = vector.broadcast %17 : vector<1x128xf32> to vector<16x128xf32>
    %19 = arith.addf %16, %18 : vector<16x128xf32>
    %c0_17 = arith.constant 0 : index
    %c0_18 = arith.constant 0 : index
    %20 = vector.load %arg8[%c0_17, %c0_18] : memref<16x128xf32, #tpu.memory_space<vmem>>, vector<16x128xf32>
    tpu.vector_store %arg8[%c0_17, %c0_18], %19 {strides = array<i32>} : memref<16x128xf32, #tpu.memory_space<vmem>>, vector<16x128xf32>,
    return
  }
  func.func @transform_0(%arg0: i32) -> (i32, i32) {
    %c0_i32 = arith.constant 0 : i32
    %c0_i32_0 = arith.constant 0 : i32
    return %arg0, %c0_i32 : i32, i32
  }
  func.func @transform_1(%arg0: i32) -> (i32, i32) {
    %c0_i32 = arith.constant 0 : i32
    %c0_i32_0 = arith.constant 0 : i32
    %c0_i32_1 = arith.constant 0 : i32
    return %c0_i32, %c0_i32_0 : i32, i32
  }
  func.func @transform_2(%arg0: i32) -> (i32, i32) {
    %c0_i32 = arith.constant 0 : i32
    %c0_i32_0 = arith.constant 0 : i32
    %c0_i32_1 = arith.constant 0 : i32
    return %c0_i32, %c0_i32_0 : i32, i32
  }
  func.func @transform_3(%arg0: i32) -> (i32, i32) {
    %c0_i32 = arith.constant 0 : i32
    %c0_i32_0 = arith.constant 0 : i32
    %c0_i32_1 = arith.constant 0 : i32
    return %c0_i32, %c0_i32_0 : i32, i32
  }
  func.func @transform_4(%arg0: i32) -> (i32, i32) {
    %c0_i32 = arith.constant 0 : i32
    %c0_i32_0 = arith.constant 0 : i32
    %c0_i32_1 = arith.constant 0 : i32
    return %c0_i32, %c0_i32_0 : i32, i32
  }
  func.func @transform_5(%arg0: i32) -> (i32, i32) {
    %c0_i32 = arith.constant 0 : i32
    %c0_i32_0 = arith.constant 0 : i32
    %c0_i32_1 = arith.constant 0 : i32
    return %c0_i32, %c0_i32_0 : i32, i32
  }
  func.func @transform_6(%arg0: i32) -> (i32, i32) {
    %c0_i32 = arith.constant 0 : i32
    %c0_i32_0 = arith.constant 0 : i32
    %c0_i32_1 = arith.constant 0 : i32
    return %c0_i32, %c0_i32_0 : i32, i32
  }
  func.func @transform_7(%arg0: i32) -> (i32, i32) {
    %c0_i32 = arith.constant 0 : i32
    %c0_i32_0 = arith.constant 0 : i32
    return %arg0, %c0_i32 : i32, i32
  }
}

</mosaic_0001>

<bundles_post_ra>
// kernel: tpu_custom_call.1
= control target key start
LH: loop header
LB: loop body
LE: loop exit
PB: predicated region body
PF: predicated region fallthrough
CT: control target
= control target key end

     0   :  { %12 = vsyncpa [#allocation3], 0  ;;  %s1126_s0 = inlined_call_operand.vmem [shape: f32[32,16], index: 0, kind: input, shape index: {}]   ;;  %s1127_s1 = inlined_call_operand.hbm [shape: f32[16,32], index: 1, kind: input, shape index: {}]   ;;  %s1128_s2 = inlined_call_operand.vmem [shape: f32[1,32], index: 2, kind: input, shape index: {}]   ;;  %s1129_s3 = inlined_call_operand.vmem [shape: f32[32,32], index: 3, kind: input, shape index: {}]   ;;  %s1130_s4 = inlined_call_operand.vmem [shape: f32[1,32], index: 4, kind: input, shape index: {}]   ;;  %s1131_s5 = inlined_call_operand.vmem [shape: f32[32,128], index: 5, kind: input, shape index: {}]   ;;  %s1132_s6 = inlined_call_operand.vmem [shape: f32[1,128], index: 6, kind: input, shape index: {}]   ;;  %s1133_s7 = inlined_call_operand.hbm [shape: f32[32,128], index: 7, kind: output, shape index: {}]  }
   0x1   :  { %13 = vsyncpa [#allocation4], 0 }
   0x2   :  { %15 = vsyncpa [#allocation4 + $0x1], 0  ;;  %s952_s24 = smov 0   ;;  %s954_s25 = smov 0  }
   0x3   :  { %s956_s26 = smov 0   ;;  %s958_s27 = smov 0  }
   0x4 LB: > { %s973_s28 = sadd.s32 4294967295, %s904_s27   ;;  %s667_s29 = sadd.s32 4294967294, %s904_s27   ;;  %s904_s27 = sphi %s958_s27, %s1149_s27   ;;  %s900_s26 = sphi %s956_s26, %s1148_s26   ;;  %s896_s25 = sphi %s954_s25, %s1147_s25   ;;  %s892_s24 = sphi %s952_s24, %s1146_s24  }
   0x5   : > { %s977_s30 = sadd.s32 1, %s904_s27   ;;  %s180_s8 = sadd.s32 1, %s900_s26 }
   0x6   : > { %s177_s9 = ssub.s32 %s904_s27, %s977_s30  ;;  %p190_p0 = scmp.ne.s32.totalorder %s900_s26, %s896_s25 }
   0x7   : > { %p178_p1 = scmp.eq.s32.totalorder %s177_s9, 0  ;;  %p191_p2 = scmp.eq.s32.totalorder %s973_s28, 1 }
   0x8   : > { %p196_p3 = scmp.ne.s32.totalorder %s896_s25, %s892_s24  ;;  %p197_p4 = scmp.eq.s32.totalorder %s667_s29, 1 }
   0x9   : > { %s988_s10 = scalar_select %p178_p1, %s900_s26, %s180_s8  }
   0xa   : > { %p990_p5 = por %p191_p2, %p190_p0  ;;  %p994_p6 = por %p197_p4, %p196_p3 }
   0xb   : > { %p668_p7 = scmp.ge.s32.totalorder %s904_s27, 1  ;;  %p204_p8 = scmp.lt.s32.totalorder %s904_s27, 3 }
   0xc   : > { %s1137_s11 = scalar_select %p990_p5, 1, 0 }
   0xd   : > { %s1138_s12 = scalar_select %p994_p6, 1, 0 }
   0xe   : > { %p1134_p9 = scmp.eq.s32.totalorder %s973_s28, 0  ;;  %p1001_p10 = pnand %p668_p7, %p204_p8 }
   0xf   : > { %s906_s14 = smov [#allocation2]   ;;  %s810_s19 = scalar_lea.hbm %s1127_s1, 256 }
  0x10   : > { %s1139_s13 = scalar_select %p1001_p10, 1, 0 }
  0x11   : > { %s216_s15 = sshll.u32 %s906_s14, 4  ;;  %p762_p11 = pneg %p1001_p10  ;;  %s217_s15 = int_to_ptr.vmem [resolvable:$true] %s216_s15 }
  0x12   : > { %p811_p13 = scmp.ne.s32.totalorder %s1127_s1, %s810_s19  ;;  %p817_p3 = scmp.lt.u32.totalorder %s810_s19, %s1127_s1 }
  0x13   : > { %p1009_p12 = pnand %p1134_p9, %p762_p11 }
  0x15   : > { %p812_p0 = pneg %p1009_p12 }
  0x17   : > { %p813_p1 = pnand %p812_p0, %p811_p13 }
  0x19   : > { %p814_p2 = pneg %p813_p1 }
  0x1b   : > { %p819_p4 = pnand %p817_p3, %p814_p2 }
  0x1d   : > { %822 = shalt.err (!%p819_p4)
}
  0x1e   : > { %s823_s29 = scalar_lea.vmem %s217_s15, 256  ;;  %p831_p9 = scmp.lt.s32.totalorder %s217_s15, %s217_s15 }
  0x1f   : > { %p824_p7 = scmp.ne.s32.totalorder %s217_s15, %s823_s29  ;;  %p832_p6 = scmp.lt.s32.totalorder %s823_s29, %s823_s29 }
  0x21   : > { %p826_p8 = pnand %p824_p7, %p812_p0  ;;  %p833_p5 = por %p832_p6, %p831_p9 }
  0x23   : > { %p827_p11 = pneg %p826_p8 }
  0x25   : > { %p834_p10 = pnand %p833_p5, %p827_p11 }
  0x27   : > { %837 = shalt.err (!%p834_p10)
}
  0x28   : > { %s907_s8 = smov 128   ;;  %s908_s9 = smov 8  }
  0x29   : > { %765 = dma.hbm_to_vmem [thread:$0]  (!%p1009_p12), %s1127_s1, 256, %s217_s15, [#allocation3], %s907_s8, %s907_s8, %s908_s9  }
  0x2a   : > { %p1141_p13 = scmp.ne.s32.totalorder %s1139_s13, 0 }
  0x2b   : > { %p1142_p1 = scmp.eq.s32.totalorder (!%p1141_p13), %s973_s28, 0 }
  0x2c   : > { %256 = sbr.rel (%p1141_p13) target bundleno = 726 (0x2d6), region = 48 }
  0x33   : > { %883 = dma.done.wait (%p1142_p1), [#allocation3], 256   ;;  %p1143_p0 = pmov %p1142_p1 }
  0x34   : > { %s674_s18 = sshll.u32 %s973_s28, 1  ;;  %vm314_vm0 = vcmask 130048   ;;  %v297_v0 = vld [vmem:[#allocation2] sm:$0xff]  ;;  %v298_v1 = vld [vmem:[#allocation2 + $0x8] sm:$0xff]  ;;  %v301_v8 = vld [vmem:[%s1129_s3 + $0x10] sm:$0xff]  ;;  %vm405_vm1 = vcmask 261120  }
  0x35   : > { %885 = vsyncadd (%p1143_p0), [#allocation3], 4294967040  ;;  %p289_p5 = scmp.lt.s32.totalorder %s674_s18, 3  ;;  %v736_v3 = vpack.c.bf16 %v298_v1, %v297_v0  ;;  %v299_v4 = vld [vmem:[%s1129_s3] sm:$0xff]  ;;  %v300_v5 = vld [vmem:[%s1129_s3 + $0x8] sm:$0xff]  ;;  %s285_s9 = sand.u32 1, %s896_s25  }
  0x36   : > { %v740_v6 = vpack.c.bf16 %v300_v5, %v299_v4  ;;  %v302_v9 = vld [vmem:[%s1129_s3 + $0x18] sm:$0xff]  ;;  %v303_v11 = vld [vmem:[%s1131_s5] sm:$0xff]  ;;  %v304_v12 = vld [vmem:[%s1131_s5 + $0x8] sm:$0xff]  ;;  %s673_s14 = sshll.u32 %s285_s9, 4  ;;  %s690_s20 = sshll.u32 %s973_s28, 8 }
  0x37   : > { %s1151_s18 = smov (!%p289_p5, %s674_s18), 3  ;;  %737 = vmatprep.subr.bf16.mxu0 %v736_v3  ;;  %v744_v10 = vpack.c.bf16 %v302_v9, %v301_v8  ;;  %v748_v13 = vpack.c.bf16 %v304_v12, %v303_v11  ;;  %v676_v14 = vld [vmem:[%s1128_s2] ss:$0 sm:$0xff]  ;;  %v305_v21 = vld [vmem:[%s1131_s5 + $0x10] sm:$0xff]  ;;  %v306_v22 = vld [vmem:[%s1131_s5 + $0x18] sm:$0xff]  ;;  %s1083_s15 = scalar_lea.hbm %s1133_s7, %s690_s20 }
  0x38   : > { %s675_s19 = sshll.u32 %s1151_s18, 3  ;;  %739 = vmatpush3.bf16.msra.mxu0 %v736_v3  ;;  %741 = vmatprep.subr.bf16.mxu1 %v740_v6  ;;  %v752_v23 = vpack.c.bf16 %v306_v22, %v305_v21  ;;  %v679_v24 = vld [vmem:[%s1130_s4] ss:$0 sm:$0xff]  ;;  %s1085_s22 = scalar_lea.sflag [#allocation4], %s285_s9 }
  0x39   : > { %s292_s21 = scalar_lea.vmem %s1126_s0, %s675_s19  ;;  %743 = vmatpush3.bf16.msra.mxu1 %v740_v6  ;;  %749 = vmatprep.subr.bf16.mxu0 %v748_v13  ;;  %v682_v31 = vld [vmem:[%s1132_s6] ss:$0 sm:$0xff]  ;;  %s287_s19 = scalar_lea.vmem [#allocation5], %s673_s14 }
  0x3a   : > { %v295_v2 = vld [vmem:[%s292_s21] sm:$0xff]  ;;  %v296_v7 = vld [vmem:[%s292_s21 + $0x8] sm:$0xff]  ;;  %745 = vmatprep.subr.bf16.mxu1 %v744_v10  ;;  %s593_s16 = sshll.u32 %s287_s19, 4  ;;  %p1144_p9 = scmp.ne.s32.totalorder %s1137_s11, 0  ;;  %s1078_s16 = int_to_ptr.vmem [resolvable:$true] %s593_s16 }
  0x3b   : > { %711 = vmatprep.mubr.msk.f32.mxu0 %vm314_vm0, %v295_v2  ;;  %s838_s23 = scalar_lea.vmem %s1078_s16, 256  ;;  %s909_s28 = smov [#allocation5]  }
  0x3c   : > { %712 = vmatmul.mubr.msk.f32.vlgmr.msra.gmra.mrb[0].mxu0 %vm314_vm0, %v296_v7  ;;  %p839_p6 = scmp.ne.s32.totalorder %s1078_s16, %s838_s23  ;;  %s842_s29 = sshll.u32 %s909_s28, 4  ;;  %s843_s29 = int_to_ptr.vmem [resolvable:$false] %s842_s29 }
  0x3d   : > { %747 = vmatpush3.bf16.msra.mxu1 %v744_v10  ;;  %751 = vmatpush3.bf16.msra.mxu0 %v748_v13  ;;  %s844_s8 = scalar_lea.vmem %s843_s29, 512  ;;  %p845_p2 = scmp.lt.s32.totalorder %s1078_s16, %s843_s29 }
  0x3e   : > { %753 = vmatprep.subr.bf16.mxu0 %v752_v23  ;;  %p840_p10 = pnand %p839_p6, %p1144_p9  ;;  %p846_p3 = scmp.lt.s32.totalorder %s844_s8, %s838_s23 }
  0x40   : > { %p841_p12 = pneg %p840_p10  ;;  %p847_p4 = por %p846_p3, %p845_p2 }
  0x41   : > { %755 = vmatpush3.bf16.msra.mxu0 %v752_v23 }
  0x42   : > { %p848_p7 = pnand %p847_p4, %p841_p12 }
 0x10f   : > { %v713_v15 = vpop.f32.mrb[0].mxu0 }
 0x110   : > { %v393_v16 = vadd.f32 %v713_v15, %v676_v14  ;;  %v387_v17 = vpop.f32.mrb[1].mxu0 }
 0x111   : > { %v388_v18 = vadd.f32 %v676_v14, %v387_v17 }
 0x112   : > { %v397_v20 = vmax.f32 %v393_v16, 0.0 }
 0x113   : > { %v396_v19 = vmax.f32 %v388_v18, 0.0 }
 0x115   : > { %722 = vmatprep.mubr.msk.f32.mxu1 %vm405_vm1, %v396_v19 }
 0x116   : > { %723 = vmatmul.mubr.msk.f32.vlgmr.msra.gmra.mrb[0].mxu1 %vm405_vm1, %v397_v20 }
 0x1e9   : > { %v724_v25 = vpop.f32.mrb[0].mxu1 }
 0x1ea   : > { %v484_v26 = vadd.f32 %v724_v25, %v679_v24  ;;  %v478_v27 = vpop.f32.mrb[1].mxu1 }
 0x1eb   : > { %v479_v28 = vadd.f32 %v679_v24, %v478_v27 }
 0x1ec   : > { %v488_v30 = vmax.f32 %v484_v26, 0.0 }
 0x1ed   : > { %v487_v29 = vmax.f32 %v479_v28, 0.0 }
 0x1ef   : > { %733 = vmatprep.mubr.msk.f32.mxu0 %vm405_vm1, %v487_v29 }
 0x1f0   : > { %734 = vmatmul.mubr.msk.f32.vlgmr.msra.gmra.mrb[2].mxu0 %vm405_vm1, %v488_v30 }
 0x2c3   : > { %v735_v32 = vpop.f32.mrb[2].mxu0 }
 0x2c4   : > { %v574_v33 = vadd.f32 %v735_v32, %v682_v31  ;;  %v568_v34 = vpop.f32.mrb[3].mxu0 }
 0x2c5   : > { %v569_v35 = vadd.f32 %v682_v31, %v568_v34 }
 0x2c6   : > { %578 = vst [vmem:[%s287_s19 + $0x8] sm:$0xff] %v574_v33 }
 0x2c7   : > { %577 = vst [vmem:[%s287_s19] sm:$0xff] %v569_v35 }
 0x2c8   : > { %851 = shalt.err (!%p848_p7)
}
 0x2c9   : > { %s852_s9 = scalar_lea.hbm %s1083_s15, 256  ;;  %s856_s18 = scalar_lea.hbm %s1133_s7, 512 }
 0x2ca   : > { %p853_p8 = scmp.ne.s32.totalorder %s1083_s15, %s852_s9  ;;  %p857_p1 = scmp.lt.u32.totalorder %s1083_s15, %s1133_s7 }
 0x2cb   : > { %p858_p0 = scmp.lt.u32.totalorder %s856_s18, %s852_s9  ;;  %p860_p6 = scmp.lt.u32.totalorder %s852_s9, %s1083_s15 }
 0x2cc   : > { %p854_p11 = pnand %p853_p8, %p1144_p9 }
 0x2cd   : > { %p859_p5 = por %p858_p0, %p857_p1 }
 0x2ce   : > { %p855_p13 = pneg %p854_p11 }
 0x2cf   : > { %p861_p10 = por %p860_p6, %p859_p5 }
 0x2d1   : > { %p862_p12 = pnand %p861_p10, %p855_p13 }
 0x2d3   : > { %865 = shalt.err (!%p862_p12)
}
 0x2d4   : > { %s910_s21 = smov 128   ;;  %s911_s13 = smov 8  }
 0x2d5   : > { %760 = dma.vmem_to_hbm [thread:$0]  (%p1144_p9), %s1078_s16, 256, %s1083_s15, %s1085_s22, %s910_s21, %s910_s21, %s911_s13  }
 0x2d6 PF: > { %p772_p2 = scmp.ge.s32.totalorder %s904_s27, 2  ;;  %s608_s23 = sand.u32 1, %s892_s24  }
 0x2d7   : > { %p1145_p3 = scmp.ne.s32.totalorder %s1138_s12, 0  ;;  %s609_s28 = scalar_lea.sflag [#allocation4], %s608_s23 }
 0x2d9   : > { %p767_p4 = pnand %p772_p2, %p1145_p3 }
 0x2db   : > { %887 = dma.done.wait (!%p767_p4), %s609_s28, 256  }
 0x2dc   : > { %889 = vsyncadd (!%p767_p4), %s609_s28, 4294967040  ;;  %p18_p7 = scmp.ge.s32.totalorder %s977_s30, 4   ;;  %s1146_s24 = smov %s896_s25 }
 0x2dd   : > { %s1147_s25 = smov %s900_s26  ;;  %s1148_s26 = smov %s988_s10 }
 0x2de   : > { %s1149_s27 = smov %s977_s30  ;;  %20 = sbr.rel (!%p18_p7) target bundleno = 4 (0x4), region = 88 }
 0x2e5   :  { %614 = vsyncpa [#allocation3], 1 }
 0x2e6   :  { %616 = vsyncpa [#allocation3 + $0x1], 1 }
 0x2e7   :  { %617 = vsyncpa [#allocation4], 1 }
 0x2e8   :  { %619 = vsyncpa [#allocation4 + $0x1], 1 }

</bundles_post_ra>
